<compile_context>
chip_gen: v7x
topology: tpu7x:2x2x1
jax: 0.10.0
libtpu: 0.0.40
codegen_flags: <defaults>
</compile_context>

<pallas_src>
import math

import jax
import jax.numpy as jnp
from jax.experimental import pallas as pl
from jax.experimental.pallas import tpu as pltpu


# --------------------------------------------------------------------------
# Kernel 1: fused QKV projection over the (B*S, H) token slab.
# --------------------------------------------------------------------------
def _qkv_proj_kernel(x_ref, w_ref, b_ref, o_ref):
    """x_ref: (TM, H) bf16, w_ref: (H, 3H) bf16, b_ref: (1, 3H) f32,
    o_ref: (TM, 3H) bf16."""
    acc = jnp.dot(x_ref[...], w_ref[...], preferred_element_type=jnp.float32)
    o_ref[...] = (acc + b_ref[...]).astype(o_ref.dtype)


# --------------------------------------------------------------------------
# Kernel 2: flash attention (online softmax) + fused output projection.
# --------------------------------------------------------------------------
def _flash_attn_outproj_kernel(q_ref, k_ref, v_ref, wo_ref, bo_ref, out_ref,
                               m_sc, l_sc, acc_sc):
    """Per grid step (b, qi, ki):
      q_ref:   (heads, TQ, d)   bf16
      k_ref:   (heads, TK, d)   bf16
      v_ref:   (heads, TK, d)   bf16
      wo_ref:  (H, H)           bf16   (in, out) layout
      bo_ref:  (1, H)           f32
      out_ref: (TQ, H)          written only at the last kv step
      m_sc/l_sc: (heads, TQ, 1) f32 online-softmax stats
      acc_sc:    (heads, TQ, d) f32 context accumulator
    """
    ki = pl.program_id(2)
    head_size = q_ref.shape[-1]
    inv_sqrt_d = 1.0 / math.sqrt(head_size)

    @pl.when(ki == 0)
    def _init():
        m_sc[...] = jnp.full(m_sc.shape, -jnp.inf, m_sc.dtype)
        l_sc[...] = jnp.zeros(l_sc.shape, l_sc.dtype)
        acc_sc[...] = jnp.zeros(acc_sc.shape, acc_sc.dtype)

    q = q_ref[...]
    k = k_ref[...]
    v = v_ref[...]

    # Batched-head score matmul; contraction over d, no explicit transposes.
    s = jnp.einsum("hqd,hkd->hqk", q, k,
                   preferred_element_type=jnp.float32) * inv_sqrt_d

    # Online (streaming) softmax update.
    m_prev = m_sc[...]
    m_new = jnp.maximum(m_prev, jnp.max(s, axis=-1, keepdims=True))
    alpha = jnp.exp(m_prev - m_new)                       # rescale old stats
    p = jnp.exp(s - m_new)
    l_sc[...] = alpha * l_sc[...] + jnp.sum(p, axis=-1, keepdims=True)
    acc_sc[...] = alpha * acc_sc[...] + jnp.einsum(
        "hqk,hkd->hqd", p.astype(v.dtype), v,
        preferred_element_type=jnp.float32)
    m_sc[...] = m_new

    # Finalize once per (b, q-tile): normalize, relayout to (TQ, H) and run the
    # full-H-contraction output projection (attn_dropout / proj_dropout are
    # p=0.0 -> identity in the reference module).
    @pl.when(ki == pl.num_programs(2) - 1)
    def _finalize():
        ctx = acc_sc[...] * pl.reciprocal(l_sc[...], approx=True)
        heads, tq, d = ctx.shape
        ctx2d = ctx.transpose(1, 0, 2).reshape(tq, heads * d)
        out = jnp.dot(ctx2d.astype(wo_ref.dtype), wo_ref[...],
                      preferred_element_type=jnp.float32) + bo_ref[...]
        out_ref[...] = out.astype(out_ref.dtype)


# --------------------------------------------------------------------------
# Host-side helpers.
# --------------------------------------------------------------------------
def _vmem_budget():
    """Per-generation VMEM limit (bytes) and whether this is a big-VMEM chip."""
    cap = 64 * 1024 * 1024                      # conservative fallback (v7x)
    try:
        cap = int(pltpu.get_tpu_info().vmem_capacity_bytes)
    except Exception:
        pass
    big = cap >= 96 * 1024 * 1024               # v5e / v6e: 128 MiB
    limit = min(cap - 16 * 1024 * 1024, 100 * 1024 * 1024)
    limit = max(limit, 32 * 1024 * 1024)
    return int(limit), big


def _pick_tile(total, target):
    """Largest multiple-of-8 divisor of `total` that is <= target (or total)."""
    if total <= target:
        return total
    for t in range(target - target % 8, 7, -8):
        if total % t == 0:
            return t
    return total    # no clean divisor: single tile (see TODO on masking)


# --------------------------------------------------------------------------
# Forward wrapper.
# --------------------------------------------------------------------------
def gatn_attention_forward(hidden_states, params, *, num_heads,
                           compute_dtype=jnp.bfloat16,
                           single_buffer_weights=True):
    """hidden_states: (B, S, H).  Returns (attention_output, weights=None)."""
    B, S, H = hidden_states.shape
    assert H % num_heads == 0, "hidden_size must divide evenly across heads"
    head_size = H // num_heads

    wq, bq, wk, bk, wv, bv, wo, bo = params

    # torch Linear stores weight as (out, in): transpose to (in, out) and fuse
    # Q/K/V into one (H, 3H) weight + (1, 3H) bias on the host.
    w_qkv = jnp.concatenate([wq.T, wk.T, wv.T], axis=1).astype(compute_dtype)
    b_qkv = jnp.concatenate([bq, bk, bv]).reshape(1, 3 * H).astype(jnp.float32)
    wo_t = wo.T.astype(compute_dtype)
    bo2 = bo.reshape(1, H).astype(jnp.float32)

    vmem_limit, big_vmem = _vmem_budget()
    # Weights/biases never change block index -> single-buffer them.
    wmode = {"pipeline_mode": pl.Buffered(1)} if single_buffer_weights else {}

    # ---------------- Kernel 1: QKV projection over (B*S, H) ----------------
    BS = B * S
    tm = min(512 if big_vmem else 256, BS)
    x2d = hidden_states.reshape(BS, H).astype(compute_dtype)

    qkv = pl.pallas_call(
        _qkv_proj_kernel,
        out_shape=jax.ShapeDtypeStruct((BS, 3 * H), compute_dtype),
        grid=(pl.cdiv(BS, tm),),
        in_specs=[
            pl.BlockSpec((tm, H), lambda i: (i, 0)),
            pl.BlockSpec((H, 3 * H), lambda i: (0, 0), **wmode),
            pl.BlockSpec((1, 3 * H), lambda i: (0, 0), **wmode),
        ],
        out_specs=pl.BlockSpec((tm, 3 * H), lambda i: (i, 0)),
        compiler_params=pltpu.CompilerParams(
            dimension_semantics=("parallel",),
            vmem_limit_bytes=vmem_limit,
        ),
    )(x2d, w_qkv, b_qkv)

    # Host-side (XLA) relayout to (B, heads, S, d) per tensor — kept outside
    # the kernel so no in-kernel lane-narrow slices / transposes are needed.
    qkv5 = jnp.transpose(qkv.reshape(B, S, 3, num_heads, head_size),
                         (2, 0, 3, 1, 4))
    q, k, v = qkv5[0], qkv5[1], qkv5[2]

    # ------------- Kernel 2: flash attention + output projection ------------
    t_target = 512 if big_vmem else 256
    tq = _pick_tile(S, t_target)
    tk = _pick_tile(S, t_target)
    n_q = S // tq
    n_kv = S // tk

    out = pl.pallas_call(
        _flash_attn_outproj_kernel,
        out_shape=jax.ShapeDtypeStruct((B, S, H), hidden_states.dtype),
        grid=(B, n_q, n_kv),
        in_specs=[
            pl.BlockSpec((None, num_heads, tq, head_size),
                         lambda b, qi, ki: (b, 0, qi, 0)),
            pl.BlockSpec((None, num_heads, tk, head_size),
                         lambda b, qi, ki: (b, 0, ki, 0)),
            pl.BlockSpec((None, num_heads, tk, head_size),
                         lambda b, qi, ki: (b, 0, ki, 0)),
            pl.BlockSpec((H, H), lambda b, qi, ki: (0, 0), **wmode),
            pl.BlockSpec((1, H), lambda b, qi, ki: (0, 0), **wmode),
        ],
        out_specs=pl.BlockSpec((None, tq, H), lambda b, qi, ki: (b, qi, 0)),
        scratch_shapes=[
            pltpu.VMEM((num_heads, tq, 1), jnp.float32),          # running max
            pltpu.VMEM((num_heads, tq, 1), jnp.float32),          # running denom
            pltpu.VMEM((num_heads, tq, head_size), jnp.float32),  # context acc
        ],
        compiler_params=pltpu.CompilerParams(
            dimension_semantics=("parallel", "parallel", "arbitrary"),
            vmem_limit_bytes=vmem_limit,
        ),
    )(q, k, v, wo_t, bo2)

    return out, None   # self.vis is False -> weights is None


# --------------------------------------------------------------------------
# Pure-JAX f32 reference mirroring the PyTorch module exactly.
# --------------------------------------------------------------------------
def _reference_forward(x, params, *, num_heads):
    wq, bq, wk, bk, wv, bv, wo, bo = params
    B, S, H = x.shape
    d = H // num_heads

    def split(t):  # (B,S,H) -> (B,heads,S,d)
        return t.reshape(B, S, num_heads, d).transpose(0, 2, 1, 3)

    q = split(x @ wq.T + bq)
    k = split(x @ wk.T + bk)
    v = split(x @ wv.T + bv)
    scores = jnp.einsum("bhqd,bhkd->bhqk", q, k) / math.sqrt(d)
    probs = jax.nn.softmax(scores, axis=-1)
    ctx = jnp.einsum("bhqk,bhkd->bhqd", probs, v)
    ctx = ctx.transpose(0, 2, 1, 3).reshape(B, S, H)
    return ctx @ wo.T + bo


if __name__ == "__main__":
    hidden_size = 32          # not 11/13/17 -> 4 attention heads (module rule)
    num_heads = 1 if hidden_size in (11, 13, 17) else 4
    batch, seq = 2, 8

    key = jax.random.PRNGKey(0)
    keys = jax.random.split(key, 9)

    def mk_w(k):  # torch Linear layout: weight (out, in)
        return jax.random.normal(k, (hidden_size, hidden_size), jnp.float32) * 0.1

    def mk_b(k):
        return jax.random.normal(k, (hidden_size,), jnp.float32) * 0.1

    params = (mk_w(keys[0]), mk_b(keys[1]),   # query
              mk_w(keys[2]), mk_b(keys[3]),   # key
              mk_w(keys[4]), mk_b(keys[5]),   # value
              mk_w(keys[6]), mk_b(keys[7]))   # out

    hidden_states = jax.random.normal(keys[8], (batch, seq, hidden_size),
                                      jnp.float32)

    def run(single_buffer):
        o, w = gatn_attention_forward(hidden_states, params,
                                      num_heads=num_heads,
                                      single_buffer_weights=single_buffer)
        return jax.block_until_ready(o), w

    try:
        out, weights = run(True)
    except Exception:
        # pipeline_mode=pl.Buffered(1) unsupported on this jax version:
        # fall back to default (double-buffered) weight specs.
        out, weights = run(False)

    ref = _reference_forward(hidden_states, params, num_heads=num_heads)
    assert out.shape == (batch, seq, hidden_size)
    assert weights is None
    # bf16 matmul operands + approximate reciprocal -> loosened tolerance.
    assert jnp.allclose(out, ref, atol=3e-2, rtol=3e-2), "mismatch vs reference"

    print("KERNEL_OK")
</pallas_src>

<mosaic_0001>
module attributes {stable_mosaic.version = 11 : i64} {
  func.func @_qkv_proj_kernel(%arg0: i32, %arg1: memref<16x32xbf16, #tpu.memory_space<vmem>>, %arg2: memref<32x96xbf16, #tpu.memory_space<vmem>>, %arg3: memref<1x96xf32, #tpu.memory_space<vmem>>, %arg4: memref<16x96xbf16, #tpu.memory_space<vmem>>) attributes {dimension_semantics = [#tpu.dimension_semantics<parallel>], iteration_bounds = array<i64: 1>, scalar_prefetch = 0 : i64, scratch_operands = 0 : i64, tpu.core_type = #tpu.core_type<tc>, window_params = [{transform_indices = @transform_0, window_bounds = array<i64: 16, 32>}, {pipeline_mode = #tpu.pipeline_mode<synchronous>, transform_indices = @transform_1, window_bounds = array<i64: 32, 96>}, {pipeline_mode = #tpu.pipeline_mode<synchronous>, transform_indices = @transform_2, window_bounds = array<i64: 1, 96>}, {transform_indices = @transform_3, window_bounds = array<i64: 16, 96>}]} {
    %c0 = arith.constant 0 : index
    %c0_0 = arith.constant 0 : index
    %0 = vector.load %arg1[%c0, %c0_0] : memref<16x32xbf16, #tpu.memory_space<vmem>>, vector<16x32xbf16>
    %c0_1 = arith.constant 0 : index
    %c0_2 = arith.constant 0 : index
    %1 = vector.load %arg2[%c0_1, %c0_2] : memref<32x96xbf16, #tpu.memory_space<vmem>>, vector<32x96xbf16>
    %cst = arith.constant dense<0.000000e+00> : vector<16x96xf32>
    %2 = tpu.matmul %0, %1, %cst {dimension_numbers = #tpu.dot_dimension_numbers<[1], [0], [0], [1], [0, 0, 1, 1], [], []>} : vector<16x32xbf16>, vector<32x96xbf16>, vector<16x96xf32> -> vector<16x96xf32>
    %c0_3 = arith.constant 0 : index
    %c0_4 = arith.constant 0 : index
    %3 = vector.load %arg3[%c0_3, %c0_4] : memref<1x96xf32, #tpu.memory_space<vmem>>, vector<1x96xf32>
    %4 = vector.broadcast %3 : vector<1x96xf32> to vector<16x96xf32>
    %5 = arith.addf %2, %4 : vector<16x96xf32>
    %6 = arith.truncf %5 : vector<16x96xf32> to vector<16x96xbf16>
    %c0_5 = arith.constant 0 : index
    %c0_6 = arith.constant 0 : index
    %7 = vector.load %arg4[%c0_5, %c0_6] : memref<16x96xbf16, #tpu.memory_space<vmem>>, vector<16x96xbf16>
    tpu.vector_store %arg4[%c0_5, %c0_6], %6 {strides = array<i32>} : memref<16x96xbf16, #tpu.memory_space<vmem>>, vector<16x96xbf16>,
    return
  }
  func.func @transform_0(%arg0: i32) -> (i32, i32) {
    %c0_i32 = arith.constant 0 : i32
    %c0_i32_0 = arith.constant 0 : i32
    return %arg0, %c0_i32 : i32, i32
  }
  func.func @transform_1(%arg0: i32) -> (i32, i32) {
    %c0_i32 = arith.constant 0 : i32
    %c0_i32_0 = arith.constant 0 : i32
    %c0_i32_1 = arith.constant 0 : i32
    return %c0_i32, %c0_i32_0 : i32, i32
  }
  func.func @transform_2(%arg0: i32) -> (i32, i32) {
    %c0_i32 = arith.constant 0 : i32
    %c0_i32_0 = arith.constant 0 : i32
    %c0_i32_1 = arith.constant 0 : i32
    return %c0_i32, %c0_i32_0 : i32, i32
  }
  func.func @transform_3(%arg0: i32) -> (i32, i32) {
    %c0_i32 = arith.constant 0 : i32
    %c0_i32_0 = arith.constant 0 : i32
    return %arg0, %c0_i32 : i32, i32
  }
}

module attributes {stable_mosaic.version = 11 : i64} {
  func.func @_qkv_proj_kernel(%arg0: i32, %arg1: memref<16x32xbf16, #tpu.memory_space<vmem>>, %arg2: memref<32x96xbf16, #tpu.memory_space<vmem>>, %arg3: memref<1x96xf32, #tpu.memory_space<vmem>>, %arg4: memref<16x96xbf16, #tpu.memory_space<vmem>>) attributes {dimension_semantics = [#tpu.dimension_semantics<parallel>], iteration_bounds = array<i64: 1>, scalar_prefetch = 0 : i64, scratch_operands = 0 : i64, tpu.core_type = #tpu.core_type<tc>, window_params = [{transform_indices = @transform_0, window_bounds = array<i64: 16, 32>}, {pipeline_mode = #tpu.pipeline_mode<synchronous>, transform_indices = @transform_1, window_bounds = array<i64: 32, 96>}, {pipeline_mode = #tpu.pipeline_mode<synchronous>, transform_indices = @transform_2, window_bounds = array<i64: 1, 96>}, {transform_indices = @transform_3, window_bounds = array<i64: 16, 96>}]} {
    %c0 = arith.constant 0 : index
    %c0_0 = arith.constant 0 : index
    %0 = vector.load %arg1[%c0, %c0_0] : memref<16x32xbf16, #tpu.memory_space<vmem>>, vector<16x32xbf16>
    %c0_1 = arith.constant 0 : index
    %c0_2 = arith.constant 0 : index
    %1 = vector.load %arg2[%c0_1, %c0_2] : memref<32x96xbf16, #tpu.memory_space<vmem>>, vector<32x96xbf16>
    %cst = arith.constant dense<0.000000e+00> : vector<16x96xf32>
    %2 = tpu.matmul %0, %1, %cst {dimension_numbers = #tpu.dot_dimension_numbers<[1], [0], [0], [1], [0, 0, 1, 1], [], []>} : vector<16x32xbf16>, vector<32x96xbf16>, vector<16x96xf32> -> vector<16x96xf32>
    %c0_3 = arith.constant 0 : index
    %c0_4 = arith.constant 0 : index
    %3 = vector.load %arg3[%c0_3, %c0_4] : memref<1x96xf32, #tpu.memory_space<vmem>>, vector<1x96xf32>
    %4 = vector.broadcast %3 : vector<1x96xf32> to vector<16x96xf32>
    %5 = arith.addf %2, %4 : vector<16x96xf32>
    %6 = arith.truncf %5 : vector<16x96xf32> to vector<16x96xbf16>
    %c0_5 = arith.constant 0 : index
    %c0_6 = arith.constant 0 : index
    %7 = vector.load %arg4[%c0_5, %c0_6] : memref<16x96xbf16, #tpu.memory_space<vmem>>, vector<16x96xbf16>
    tpu.vector_store %arg4[%c0_5, %c0_6], %6 {strides = array<i32>} : memref<16x96xbf16, #tpu.memory_space<vmem>>, vector<16x96xbf16>,
    return
  }
  func.func @transform_0(%arg0: i32) -> (i32, i32) {
    %c0_i32 = arith.constant 0 : i32
    %c0_i32_0 = arith.constant 0 : i32
    return %arg0, %c0_i32 : i32, i32
  }
  func.func @transform_1(%arg0: i32) -> (i32, i32) {
    %c0_i32 = arith.constant 0 : i32
    %c0_i32_0 = arith.constant 0 : i32
    %c0_i32_1 = arith.constant 0 : i32
    return %c0_i32, %c0_i32_0 : i32, i32
  }
  func.func @transform_2(%arg0: i32) -> (i32, i32) {
    %c0_i32 = arith.constant 0 : i32
    %c0_i32_0 = arith.constant 0 : i32
    %c0_i32_1 = arith.constant 0 : i32
    return %c0_i32, %c0_i32_0 : i32, i32
  }
  func.func @transform_3(%arg0: i32) -> (i32, i32) {
    %c0_i32 = arith.constant 0 : i32
    %c0_i32_0 = arith.constant 0 : i32
    return %arg0, %c0_i32 : i32, i32
  }
}

</mosaic_0001>

<bundles_post_ra>
// kernel: tpu_custom_call.1
= control target key start
LH: loop header
LB: loop body
LE: loop exit
PB: predicated region body
PF: predicated region fallthrough
CT: control target
= control target key end

     0   :  { %8 = vsyncpa [#allocation3], 0  ;;  %s325_s0 = inlined_call_operand.hbm [shape: bf16[16,32], index: 0, kind: input, shape index: {}]   ;;  %s326_s1 = inlined_call_operand.hbm [shape: bf16[32,96], index: 1, kind: input, shape index: {}]   ;;  %s327_s2 = inlined_call_operand.vmem [shape: f32[1,96], index: 2, kind: input, shape index: {}]   ;;  %s328_s3 = inlined_call_operand.hbm [shape: bf16[16,96], index: 3, kind: output, shape index: {}]  }
   0x1   :  { %9 = vsyncpa [#allocation6], 0 }
   0x2   :  { %10 = vsyncpa [#allocation4], 0  ;;  %s250_s12 = smov [#allocation2]   ;;  %s178_s16 = scalar_lea.hbm %s325_s0, 128 }
   0x3   :  { %s16_s13 = sshll.u32 %s250_s12, 4  ;;  %p179_p0 = scmp.ne.s32.totalorder %s325_s0, %s178_s16  ;;  %s17_s13 = int_to_ptr.vmem [resolvable:$true] %s16_s13 }
   0x4   :  { %p182_p1 = scmp.lt.u32.totalorder %s178_s16, %s325_s0 }
   0x6   :  { %p184_p2 = pnand %p182_p1, %p179_p0 }
   0x8   :  { %187 = shalt.err (!%p184_p2)
}
   0x9   :  { %s188_s21 = scalar_lea.vmem %s17_s13, 128  ;;  %p193_p4 = scmp.lt.s32.totalorder %s17_s13, %s17_s13 }
   0xa   :  { %p189_p3 = scmp.ne.s32.totalorder %s17_s13, %s188_s21  ;;  %p194_p5 = scmp.lt.s32.totalorder %s188_s21, %s188_s21 }
   0xc   :  { %p195_p6 = por %p194_p5, %p193_p4 }
   0xe   :  { %p196_p7 = pnand %p195_p6, %p189_p3 }
  0x10   :  { %199 = shalt.err (!%p196_p7)
}
  0x11   :  { %s251_s22 = smov 64   ;;  %s252_s23 = smov 4  }
  0x12   :  { %22 = dma.hbm_to_vmem [thread:$0]  %s325_s0, 128, %s17_s13, [#allocation3], %s251_s22, %s251_s22, %s252_s23  }
  0x13   :  { %s253_s26 = smov [#allocation5]   ;;  %s200_s30 = scalar_lea.hbm %s326_s1, 256 }
  0x14   :  { %s28_s27 = sshll.u32 %s253_s26, 4  ;;  %p201_p8 = scmp.ne.s32.totalorder %s326_s1, %s200_s30  ;;  %s29_s27 = int_to_ptr.vmem [resolvable:$true] %s28_s27 }
  0x15   :  { %p204_p9 = scmp.lt.u32.totalorder %s200_s30, %s326_s1 }
  0x17   :  { %p206_p10 = pnand %p204_p9, %p201_p8 }
  0x19   :  { %209 = shalt.err (!%p206_p10)
}
  0x1a   :  { %s210_s8 = scalar_lea.vmem %s29_s27, 256  ;;  %p215_p12 = scmp.lt.s32.totalorder %s29_s27, %s29_s27 }
  0x1b   :  { %p211_p11 = scmp.ne.s32.totalorder %s29_s27, %s210_s8  ;;  %p216_p13 = scmp.lt.s32.totalorder %s210_s8, %s210_s8 }
  0x1d   :  { %p217_p0 = por %p216_p13, %p215_p12 }
  0x1f   :  { %p218_p1 = pnand %p217_p0, %p211_p11 }
  0x21   :  { %221 = shalt.err (!%p218_p1)
}
  0x22   :  { %34 = dma.hbm_to_vmem [thread:$0]  %s326_s1, 256, %s29_s27, [#allocation6], %s251_s22, %s251_s22, %s252_s23  }
  0x23   :  { %244 = dma.done.wait [#allocation3], 128  }
  0x24   :  { %245 = vsyncadd [#allocation3], 4294967168 }
  0x25   :  { %246 = dma.done.wait [#allocation6], 256  }
  0x26   :  { %247 = vsyncadd [#allocation6], 4294967040  ;;  %v254_v0 = vmov 0.0   ;;  %vm255_vm0 = vmmov 0   ;;  %v175_v1 = vld [vmem:[#allocation5] sm:$0xff]   ;;  %v176_v2 = vld [vmem:[#allocation5 + $0x8] sm:$0xff]  }
  0x27   :  { %160 = vmatprep.subr.bf16.mxu0 %v254_v0  ;;  %164 = vmatprep.mubr.msk.bf16.mxu0 %vm255_vm0, %v254_v0  ;;  %v177_v3 = vld [vmem:[#allocation2] sm:$0xff]   ;;  %vm74_vm1 = vcmask 261120   ;;  %vm127_vm2 = vcmask 781312   ;;  %s256_s1 = smov [#allocation7]  }
  0x28   :  { %161 = vmatpush3.bf16.msra.mxu0 %v175_v1  ;;  %v148_v4 = vld [vmem:[%s327_s2] ss:$0 sm:$0xff]  ;;  %s135_s12 = sshll.u32 %s256_s1, 4  ;;  %s136_s12 = int_to_ptr.vmem [resolvable:$true] %s135_s12 }
  0x29   :  { %162 = vmatprep.subr.bf16.mxu0 %v254_v0  ;;  %s222_s13 = scalar_lea.vmem %s136_s12, 128  ;;  %p227_p3 = scmp.lt.s32.totalorder %s136_s12, %s136_s12 }
  0x2a   :  { %p223_p2 = scmp.ne.s32.totalorder %s136_s12, %s222_s13  ;;  %p228_p4 = scmp.lt.s32.totalorder %s222_s13, %s222_s13 }
  0x2c   :  { %163 = vmatpush3.bf16.msra.mxu0 %v176_v2  ;;  %p229_p5 = por %p228_p4, %p227_p3 }
  0x2e   :  { %p230_p6 = pnand %p229_p5, %p223_p2 }
  0x2f   :  { %165 = vmatmul.mubr.msk.bf16.vlgmr.msra.gmra.mrb[0].mxu0 %vm74_vm1, %v177_v3 }
 0x102   :  { %v112_v5 = vpop.f32.mrb[0].mxu0 }
 0x103   :  { %v113_v6 = vadd.f32 %v148_v4, %v112_v5  ;;  %v166_v7 = vpop.f32.mrb[1].mxu0 }
 0x104   :  { %v115_v8 = vpop.f32.mrb[2].mxu0 }
 0x105   :  { %v155_v9 = vpack.c.bf16 %v113_v6, %v113_v6  ;;  %v116_v10 = vadd.f32 %v148_v4, %v115_v8  ;;  %v167_v11 = vpop.f32.mrb[3].mxu0 }
 0x107   :  { %v156_v12 = vpack.c.bf16 %v116_v10, %v116_v10  ;;  %128 = vst.msk [vmem:[#allocation7] sm:$0xf] %vm127_vm2, %v155_v9 }
 0x109   :  { %129 = vst.msk [vmem:[#allocation7 + $0x4] sm:$0xf] %vm127_vm2, %v156_v12 }
 0x10a   :  { %233 = shalt.err (!%p230_p6)
}
 0x10b   :  { %s234_s15 = scalar_lea.hbm %s328_s3, 128 }
 0x10c   :  { %p235_p7 = scmp.ne.s32.totalorder %s328_s3, %s234_s15  ;;  %p238_p8 = scmp.lt.u32.totalorder %s234_s15, %s328_s3 }
 0x10e   :  { %p240_p9 = pnand %p238_p8, %p235_p7 }
 0x110   :  { %243 = shalt.err (!%p240_p9)
}
 0x111   :  { %141 = dma.vmem_to_hbm [thread:$0]  %s136_s12, 128, %s328_s3, [#allocation4], %s251_s22, %s251_s22, %s252_s23  }
 0x112   :  { %248 = dma.done.wait [#allocation4], 128  }
 0x113   :  { %249 = vsyncadd [#allocation4], 4294967168 }
 0x114   :  { %145 = vsyncpa [#allocation3], 1 }
 0x115   :  { %146 = vsyncpa [#allocation6], 1 }
 0x116   :  { %147 = vsyncpa [#allocation4], 1 }

// kernel: tpu_custom_call.1
= control target key start
LH: loop header
LB: loop body
LE: loop exit
PB: predicated region body
PF: predicated region fallthrough
CT: control target
= control target key end

     0   :  { %8 = vsyncpa [#allocation3], 0  ;;  %s325_s0 = inlined_call_operand.hbm [shape: bf16[16,32], index: 0, kind: input, shape index: {}]   ;;  %s326_s1 = inlined_call_operand.hbm [shape: bf16[32,96], index: 1, kind: input, shape index: {}]   ;;  %s327_s2 = inlined_call_operand.vmem [shape: f32[1,96], index: 2, kind: input, shape index: {}]   ;;  %s328_s3 = inlined_call_operand.hbm [shape: bf16[16,96], index: 3, kind: output, shape index: {}]  }
   0x1   :  { %9 = vsyncpa [#allocation6], 0 }
   0x2   :  { %10 = vsyncpa [#allocation4], 0  ;;  %s250_s12 = smov [#allocation2]   ;;  %s178_s16 = scalar_lea.hbm %s325_s0, 128 }
   0x3   :  { %s16_s13 = sshll.u32 %s250_s12, 4  ;;  %p179_p0 = scmp.ne.s32.totalorder %s325_s0, %s178_s16  ;;  %s17_s13 = int_to_ptr.vmem [resolvable:$true] %s16_s13 }
   0x4   :  { %p182_p1 = scmp.lt.u32.totalorder %s178_s16, %s325_s0 }
   0x6   :  { %p184_p2 = pnand %p182_p1, %p179_p0 }
   0x8   :  { %187 = shalt.err (!%p184_p2)
}
   0x9   :  { %s188_s21 = scalar_lea.vmem %s17_s13, 128  ;;  %p193_p4 = scmp.lt.s32.totalorder %s17_s13, %s17_s13 }
   0xa   :  { %p189_p3 = scmp.ne.s32.totalorder %s17_s13, %s188_s21  ;;  %p194_p5 = scmp.lt.s32.totalorder %s188_s21, %s188_s21 }
   0xc   :  { %p195_p6 = por %p194_p5, %p193_p4 }
   0xe   :  { %p196_p7 = pnand %p195_p6, %p189_p3 }
  0x10   :  { %199 = shalt.err (!%p196_p7)
}
  0x11   :  { %s251_s22 = smov 64   ;;  %s252_s23 = smov 4  }
  0x12   :  { %22 = dma.hbm_to_vmem [thread:$0]  %s325_s0, 128, %s17_s13, [#allocation3], %s251_s22, %s251_s22, %s252_s23  }
  0x13   :  { %s253_s26 = smov [#allocation5]   ;;  %s200_s30 = scalar_lea.hbm %s326_s1, 256 }
  0x14   :  { %s28_s27 = sshll.u32 %s253_s26, 4  ;;  %p201_p8 = scmp.ne.s32.totalorder %s326_s1, %s200_s30  ;;  %s29_s27 = int_to_ptr.vmem [resolvable:$true] %s28_s27 }
  0x15   :  { %p204_p9 = scmp.lt.u32.totalorder %s200_s30, %s326_s1 }
  0x17   :  { %p206_p10 = pnand %p204_p9, %p201_p8 }
  0x19   :  { %209 = shalt.err (!%p206_p10)
}
  0x1a   :  { %s210_s8 = scalar_lea.vmem %s29_s27, 256  ;;  %p215_p12 = scmp.lt.s32.totalorder %s29_s27, %s29_s27 }
  0x1b   :  { %p211_p11 = scmp.ne.s32.totalorder %s29_s27, %s210_s8  ;;  %p216_p13 = scmp.lt.s32.totalorder %s210_s8, %s210_s8 }
  0x1d   :  { %p217_p0 = por %p216_p13, %p215_p12 }
  0x1f   :  { %p218_p1 = pnand %p217_p0, %p211_p11 }
  0x21   :  { %221 = shalt.err (!%p218_p1)
}
  0x22   :  { %34 = dma.hbm_to_vmem [thread:$0]  %s326_s1, 256, %s29_s27, [#allocation6], %s251_s22, %s251_s22, %s252_s23  }
  0x23   :  { %244 = dma.done.wait [#allocation3], 128  }
  0x24   :  { %245 = vsyncadd [#allocation3], 4294967168 }
  0x25   :  { %246 = dma.done.wait [#allocation6], 256  }
  0x26   :  { %247 = vsyncadd [#allocation6], 4294967040  ;;  %v254_v0 = vmov 0.0   ;;  %vm255_vm0 = vmmov 0   ;;  %v175_v1 = vld [vmem:[#allocation5] sm:$0xff]   ;;  %v176_v2 = vld [vmem:[#allocation5 + $0x8] sm:$0xff]  }
  0x27   :  { %160 = vmatprep.subr.bf16.mxu0 %v254_v0  ;;  %164 = vmatprep.mubr.msk.bf16.mxu0 %vm255_vm0, %v254_v0  ;;  %v177_v3 = vld [vmem:[#allocation2] sm:$0xff]   ;;  %vm74_vm1 = vcmask 261120   ;;  %vm127_vm2 = vcmask 781312   ;;  %s256_s1 = smov [#allocation7]  }
  0x28   :  { %161 = vmatpush3.bf16.msra.mxu0 %v175_v1  ;;  %v148_v4 = vld [vmem:[%s327_s2] ss:$0 sm:$0xff]  ;;  %s135_s12 = sshll.u32 %s256_s1, 4  ;;  %s136_s12 = int_to_ptr.vmem [resolvable:$true] %s135_s12 }
  0x29   :  { %162 = vmatprep.subr.bf16.mxu0 %v254_v0  ;;  %s222_s13 = scalar_lea.vmem %s136_s12, 128  ;;  %p227_p3 = scmp.lt.s32.totalorder %s136_s12, %s136_s12 }
  0x2a   :  { %p223_p2 = scmp.ne.s32.totalorder %s136_s12, %s222_s13  ;;  %p228_p4 = scmp.lt.s32.totalorder %s222_s13, %s222_s13 }
  0x2c   :  { %163 = vmatpush3.bf16.msra.mxu0 %v176_v2  ;;  %p229_p5 = por %p228_p4, %p227_p3 }
  0x2e   :  { %p230_p6 = pnand %p229_p5, %p223_p2 }
  0x2f   :  { %165 = vmatmul.mubr.msk.bf16.vlgmr.msra.gmra.mrb[0].mxu0 %vm74_vm1, %v177_v3 }
 0x102   :  { %v112_v5 = vpop.f32.mrb[0].mxu0 }
 0x103   :  { %v113_v6 = vadd.f32 %v148_v4, %v112_v5  ;;  %v166_v7 = vpop.f32.mrb[1].mxu0 }
 0x104   :  { %v115_v8 = vpop.f32.mrb[2].mxu0 }
 0x105   :  { %v155_v9 = vpack.c.bf16 %v113_v6, %v113_v6  ;;  %v116_v10 = vadd.f32 %v148_v4, %v115_v8  ;;  %v167_v11 = vpop.f32.mrb[3].mxu0 }
 0x107   :  { %v156_v12 = vpack.c.bf16 %v116_v10, %v116_v10  ;;  %128 = vst.msk [vmem:[#allocation7] sm:$0xf] %vm127_vm2, %v155_v9 }
 0x109   :  { %129 = vst.msk [vmem:[#allocation7 + $0x4] sm:$0xf] %vm127_vm2, %v156_v12 }
 0x10a   :  { %233 = shalt.err (!%p230_p6)
}
 0x10b   :  { %s234_s15 = scalar_lea.hbm %s328_s3, 128 }
 0x10c   :  { %p235_p7 = scmp.ne.s32.totalorder %s328_s3, %s234_s15  ;;  %p238_p8 = scmp.lt.u32.totalorder %s234_s15, %s328_s3 }
 0x10e   :  { %p240_p9 = pnand %p238_p8, %p235_p7 }
 0x110   :  { %243 = shalt.err (!%p240_p9)
}
 0x111   :  { %141 = dma.vmem_to_hbm [thread:$0]  %s136_s12, 128, %s328_s3, [#allocation4], %s251_s22, %s251_s22, %s252_s23  }
 0x112   :  { %248 = dma.done.wait [#allocation4], 128  }
 0x113   :  { %249 = vsyncadd [#allocation4], 4294967168 }
 0x114   :  { %145 = vsyncpa [#allocation3], 1 }
 0x115   :  { %146 = vsyncpa [#allocation6], 1 }
 0x116   :  { %147 = vsyncpa [#allocation4], 1 }

</bundles_post_ra>
